<compile_context>
chip_gen: v7x
topology: tpu7x:2x2x1
jax: 0.10.0
libtpu: 0.0.40
codegen_flags: <defaults>
</compile_context>

<pallas_src>
import math
import functools

import jax
import jax.numpy as jnp
from jax.experimental import pallas as pl
from jax.experimental.pallas import tpu as pltpu


# ----------------------------------------------------------------------------
# Pallas kernel: one post-norm TransformerEncoderLayer for one batch element
# ----------------------------------------------------------------------------
def encoder_layer_kernel(x_ref, attn_mask_ref, kp_add_ref,
                         wqkv_ref, bqkv_ref, wo_ref, bo_ref,
                         ln1g_ref, ln1b_ref,
                         w1_ref, b1_ref, w2_ref, b2_ref,
                         ln2g_ref, ln2b_ref,
                         o_ref, *, nhead):
    x = x_ref[0]                                   # (S, D) f32
    S, D = x.shape
    dh = D // nhead
    scale = 1.0 / math.sqrt(dh)

    # Additive attention mask built in-kernel: shared (S,S) + per-batch (1,S).
    mask = attn_mask_ref[...] + kp_add_ref[0]      # (S, S) f32

    x_bf = x.astype(jnp.bfloat16)
    x_h = jnp.broadcast_to(x_bf[None], (nhead, S, D))          # (H, S, D) bf16

    # --- head-batched QKV projection (wqkv: (3, H, D, dh) bf16) -------------------
    q = jnp.einsum('hse,hed->hsd', x_h, wqkv_ref[0],
                   preferred_element_type=jnp.float32) + bqkv_ref[0]
    k = jnp.einsum('hse,hed->hsd', x_h, wqkv_ref[1],
                   preferred_element_type=jnp.float32) + bqkv_ref[1]
    v = jnp.einsum('hse,hed->hsd', x_h, wqkv_ref[2],
                   preferred_element_type=jnp.float32) + bqkv_ref[2]

    # --- scores + softmax (f32 stats, EUP reciprocal) ------------------------------
    s = jnp.einsum('hqd,hkd->hqk',
                   q.astype(jnp.bfloat16), k.astype(jnp.bfloat16),
                   preferred_element_type=jnp.float32) * scale
    s = s + mask[None, :, :]
    s = s - jnp.max(s, axis=-1, keepdims=True)
    p = jnp.exp(s)
    p = p * pl.reciprocal(jnp.sum(p, axis=-1, keepdims=True), approx=True)

    ctx = jnp.einsum('hqk,hkd->hqd',
                     p.astype(jnp.bfloat16), v.astype(jnp.bfloat16),
                     preferred_element_type=jnp.float32)        # (H, S, dh) f32

    # --- output projection (wo: (H, dh, D) bf16), sum over heads -------------------
    attn_h = jnp.einsum('hsd,hdo->hso',
                        ctx.astype(jnp.bfloat16), wo_ref[...],
                        preferred_element_type=jnp.float32)     # (H, S, D) f32
    attn = jnp.sum(attn_h, axis=0) + bo_ref[...]                # (S, D) f32

    # --- residual + LayerNorm 1 (post-norm, eps=1e-5, biased variance) -------------
    y = x + attn
    mu = jnp.mean(y, axis=-1, keepdims=True)
    var = jnp.mean((y - mu) ** 2, axis=-1, keepdims=True)
    y = (y - mu) * jax.lax.rsqrt(var + 1e-5) * ln1g_ref[...] + ln1b_ref[...]

    # --- feed-forward (ReLU, bf16 matmuls) + residual + LayerNorm 2 -----------------
    h1 = jnp.dot(y.astype(jnp.bfloat16), w1_ref[...],
                 preferred_element_type=jnp.float32) + b1_ref[...]
    h1 = jnp.maximum(h1, 0.0)
    ff = jnp.dot(h1.astype(jnp.bfloat16), w2_ref[...],
                 preferred_element_type=jnp.float32) + b2_ref[...]
    z = y + ff
    mu2 = jnp.mean(z, axis=-1, keepdims=True)
    var2 = jnp.mean((z - mu2) ** 2, axis=-1, keepdims=True)
    z = (z - mu2) * jax.lax.rsqrt(var2 + 1e-5) * ln2g_ref[...] + ln2b_ref[...]

    o_ref[0] = z


def encoder_layer(x, attn_mask, kp_add, p, nhead):
    """x: (B,S,D) f32; attn_mask: (S,S) f32 additive; kp_add: (B,1,S) f32 additive."""
    B, S, D = x.shape
    H = p["w1"].shape[1]
    dh = D // nhead

    def full(shape):
        return pl.BlockSpec(shape, lambda b: (0,) * len(shape))

    kernel = functools.partial(encoder_layer_kernel, nhead=nhead)
    return pl.pallas_call(
        kernel,
        out_shape=jax.ShapeDtypeStruct((B, S, D), jnp.float32),
        grid=(B,),
        in_specs=[
            pl.BlockSpec((1, S, D), lambda b: (b, 0, 0)),   # x (per batch element)
            full((S, S)),                                   # shared additive attn mask
            pl.BlockSpec((1, 1, S), lambda b: (b, 0, 0)),   # per-batch key-padding add
            full((3, nhead, D, dh)),                        # wqkv (bf16)
            full((3, nhead, 1, dh)),                        # bqkv (f32)
            full((nhead, dh, D)),                           # wo   (bf16)
            full((1, D)),                                   # bo
            full((1, D)), full((1, D)),                     # ln1 gamma / beta
            full((D, H)), full((1, H)),                     # w1 (bf16), b1
            full((H, D)), full((1, D)),                     # w2 (bf16), b2
            full((1, D)), full((1, D)),                     # ln2 gamma / beta
        ],
        out_specs=pl.BlockSpec((1, S, D), lambda b: (b, 0, 0)),
        compiler_params=pltpu.CompilerParams(
            dimension_semantics=("parallel",),
            vmem_limit_bytes=48 * 1024 * 1024),
    )(x, attn_mask, kp_add,
      p["wqkv"], p["bqkv"], p["wo"], p["bo"],
      p["ln1g"], p["ln1b"],
      p["w1"], p["b1"], p["w2"], p["b2"],
      p["ln2g"], p["ln2b"])


# ----------------------------------------------------------------------------
# Glue: embedding lookup, scaling, positional encoding, [CLS] slice
# ----------------------------------------------------------------------------
def sinusoidal_pe(max_len, d):
    assert d % 2 == 0, "sinusoidal PE assumes even d_model"
    pos = jnp.arange(max_len, dtype=jnp.float32)[:, None]
    div = jnp.exp(jnp.arange(0, d, 2, dtype=jnp.float32) * (-math.log(10000.0) / d))
    pe = jnp.zeros((max_len, d), jnp.float32)
    pe = pe.at[:, 0::2].set(jnp.sin(pos * div))
    pe = pe.at[:, 1::2].set(jnp.cos(pos * div))
    return pe


def trained_bert_hidden_cls(src, src_mask, src_key_padding_mask, params, *, nhead):
    """Equivalent of TrainedBert.forward -> TransformerModel.hidden_cls (eval mode)."""
    emb_table = params["embedding"]
    D = emb_table.shape[1]
    B, S = src.shape

    x = emb_table[src] * math.sqrt(D)                       # embedding * sqrt(d_model)
    x = x + sinusoidal_pe(S, D)[None, :, :]                 # positional encoding

    attn_mask = src_mask.astype(jnp.float32)                # shared (S,S) additive
    kp_add = jnp.where(src_key_padding_mask, -1e9, 0.0).astype(jnp.float32)
    kp_add = kp_add[:, None, :]                             # (B,1,S) additive rows

    for layer_p in params["layers"]:
        x = encoder_layer(x, attn_mask, kp_add, layer_p, nhead)
    return x[:, 0, :]                                       # output[:, 0, :]


# ----------------------------------------------------------------------------
# Deterministic synthetic parameters (no checkpoint loading)
# ----------------------------------------------------------------------------
def init_params(key, ntokens, d_model, nhead, nhid, nlayers):
    assert d_model % nhead == 0
    dh = d_model // nhead
    keys = jax.random.split(key, 1 + nlayers)
    params = {
        # matches TransformerModel.init_weights: uniform(-0.1, 0.1)
        "embedding": jax.random.uniform(keys[0], (ntokens, d_model),
                                        jnp.float32, -0.1, 0.1),
        "layers": [],
    }
    for li in range(nlayers):
        ks = jax.random.split(keys[1 + li], 4)
        layer = {
            # head-major, pre-transposed layouts; matmul weights in bf16
            "wqkv": (0.02 * jax.random.normal(
                ks[0], (3, nhead, d_model, dh), jnp.float32)).astype(jnp.bfloat16),
            "bqkv": jnp.zeros((3, nhead, 1, dh), jnp.float32),
            "wo":   (0.02 * jax.random.normal(
                ks[1], (nhead, dh, d_model), jnp.float32)).astype(jnp.bfloat16),
            "bo":   jnp.zeros((1, d_model), jnp.float32),
            "ln1g": jnp.ones((1, d_model), jnp.float32),
            "ln1b": jnp.zeros((1, d_model), jnp.float32),
            "w1":   (0.02 * jax.random.normal(
                ks[2], (d_model, nhid), jnp.float32)).astype(jnp.bfloat16),
            "b1":   jnp.zeros((1, nhid), jnp.float32),
            "w2":   (0.02 * jax.random.normal(
                ks[3], (nhid, d_model), jnp.float32)).astype(jnp.bfloat16),
            "b2":   jnp.zeros((1, d_model), jnp.float32),
            "ln2g": jnp.ones((1, d_model), jnp.float32),
            "ln2b": jnp.zeros((1, d_model), jnp.float32),
        }
        params["layers"].append(layer)
    return params


if __name__ == "__main__":
    # small shapes implied by the module: (B, S) token ids, d_model hidden
    B, S = 2, 8
    ntokens, d_model, nhead, nhid, nlayers = 50, 32, 4, 64, 2

    key = jax.random.PRNGKey(0)
    k_par, k_tok = jax.random.split(key)
    params = init_params(k_par, ntokens, d_model, nhead, nhid, nlayers)

    src = jax.random.randint(k_tok, (B, S), 0, ntokens, dtype=jnp.int32)
    src_mask = jnp.zeros((S, S), jnp.float32)                 # additive float attn mask
    src_key_padding_mask = jnp.zeros((B, S), bool).at[1, -2:].set(True)

    out = trained_bert_hidden_cls(src, src_mask, src_key_padding_mask,
                                  params, nhead=nhead)
    out = jax.block_until_ready(out)
    assert out.shape == (B, d_model)
    print("KERNEL_OK")
</pallas_src>

<mosaic_0001>
module attributes {stable_mosaic.version = 11 : i64} {
  func.func @encoder_layer_kernel(%arg0: i32, %arg1: memref<1x8x32xf32, #tpu.memory_space<vmem>>, %arg2: memref<8x8xf32, #tpu.memory_space<vmem>>, %arg3: memref<1x1x8xf32, #tpu.memory_space<vmem>>, %arg4: memref<3x4x32x8xbf16, #tpu.memory_space<vmem>>, %arg5: memref<3x4x1x8xf32, #tpu.memory_space<vmem>>, %arg6: memref<4x8x32xbf16, #tpu.memory_space<vmem>>, %arg7: memref<1x32xf32, #tpu.memory_space<vmem>>, %arg8: memref<1x32xf32, #tpu.memory_space<vmem>>, %arg9: memref<1x32xf32, #tpu.memory_space<vmem>>, %arg10: memref<32x64xbf16, #tpu.memory_space<vmem>>, %arg11: memref<1x64xf32, #tpu.memory_space<vmem>>, %arg12: memref<64x32xbf16, #tpu.memory_space<vmem>>, %arg13: memref<1x32xf32, #tpu.memory_space<vmem>>, %arg14: memref<1x32xf32, #tpu.memory_space<vmem>>, %arg15: memref<1x32xf32, #tpu.memory_space<vmem>>, %arg16: memref<1x8x32xf32, #tpu.memory_space<vmem>>) attributes {dimension_semantics = [#tpu.dimension_semantics<parallel>], iteration_bounds = array<i64: 2>, scalar_prefetch = 0 : i64, scratch_operands = 0 : i64, tpu.core_type = #tpu.core_type<tc>, window_params = [{transform_indices = @transform_0, window_bounds = array<i64: 1, 8, 32>}, {pipeline_mode = #tpu.pipeline_mode<synchronous>, transform_indices = @transform_1, window_bounds = array<i64: 8, 8>}, {transform_indices = @transform_2, window_bounds = array<i64: 1, 1, 8>}, {pipeline_mode = #tpu.pipeline_mode<synchronous>, transform_indices = @transform_3, window_bounds = array<i64: 3, 4, 32, 8>}, {pipeline_mode = #tpu.pipeline_mode<synchronous>, transform_indices = @transform_4, window_bounds = array<i64: 3, 4, 1, 8>}, {pipeline_mode = #tpu.pipeline_mode<synchronous>, transform_indices = @transform_5, window_bounds = array<i64: 4, 8, 32>}, {pipeline_mode = #tpu.pipeline_mode<synchronous>, transform_indices = @transform_6, window_bounds = array<i64: 1, 32>}, {pipeline_mode = #tpu.pipeline_mode<synchronous>, transform_indices = @transform_7, window_bounds = array<i64: 1, 32>}, {pipeline_mode = #tpu.pipeline_mode<synchronous>, transform_indices = @transform_8, window_bounds = array<i64: 1, 32>}, {pipeline_mode = #tpu.pipeline_mode<synchronous>, transform_indices = @transform_9, window_bounds = array<i64: 32, 64>}, {pipeline_mode = #tpu.pipeline_mode<synchronous>, transform_indices = @transform_10, window_bounds = array<i64: 1, 64>}, {pipeline_mode = #tpu.pipeline_mode<synchronous>, transform_indices = @transform_11, window_bounds = array<i64: 64, 32>}, {pipeline_mode = #tpu.pipeline_mode<synchronous>, transform_indices = @transform_12, window_bounds = array<i64: 1, 32>}, {pipeline_mode = #tpu.pipeline_mode<synchronous>, transform_indices = @transform_13, window_bounds = array<i64: 1, 32>}, {pipeline_mode = #tpu.pipeline_mode<synchronous>, transform_indices = @transform_14, window_bounds = array<i64: 1, 32>}, {transform_indices = @transform_15, window_bounds = array<i64: 1, 8, 32>}]} {
    %c0 = arith.constant 0 : index
    %c0_0 = arith.constant 0 : index
    %c0_1 = arith.constant 0 : index
    %0 = vector.load %arg1[%c0, %c0_0, %c0_1] : memref<1x8x32xf32, #tpu.memory_space<vmem>>, vector<1x8x32xf32>
    %1 = vector.shape_cast %0 : vector<1x8x32xf32> to vector<8x32xf32>
    %c0_2 = arith.constant 0 : index
    %c0_3 = arith.constant 0 : index
    %2 = vector.load %arg2[%c0_2, %c0_3] : memref<8x8xf32, #tpu.memory_space<vmem>>, vector<8x8xf32>
    %c0_4 = arith.constant 0 : index
    %c0_5 = arith.constant 0 : index
    %c0_6 = arith.constant 0 : index
    %3 = vector.load %arg3[%c0_4, %c0_5, %c0_6] : memref<1x1x8xf32, #tpu.memory_space<vmem>>, vector<1x1x8xf32>
    %4 = vector.shape_cast %3 : vector<1x1x8xf32> to vector<1x8xf32>
    %5 = vector.broadcast %4 : vector<1x8xf32> to vector<8x8xf32>
    %6 = arith.addf %2, %5 : vector<8x8xf32>
    %7 = arith.truncf %1 : vector<8x32xf32> to vector<8x32xbf16>
    %8 = vector.shape_cast %7 : vector<8x32xbf16> to vector<1x8x32xbf16>
    %9 = vector.shape_cast %8 : vector<1x8x32xbf16> to vector<1x8x32xbf16>
    %10 = vector.broadcast %9 : vector<1x8x32xbf16> to vector<4x8x32xbf16>
    %c0_7 = arith.constant 0 : index
    %c0_8 = arith.constant 0 : index
    %c0_9 = arith.constant 0 : index
    %c0_10 = arith.constant 0 : index
    %11 = vector.load %arg4[%c0_7, %c0_8, %c0_9, %c0_10] : memref<3x4x32x8xbf16, #tpu.memory_space<vmem>>, vector<1x4x32x8xbf16>
    %12 = vector.shape_cast %11 : vector<1x4x32x8xbf16> to vector<4x32x8xbf16>
    "tpu.trace_start"() <{level = 10 : i32, message = "hse,hed->hsd"}> : () -> ()
    %cst = arith.constant dense<0.000000e+00> : vector<4x8x8xf32>
    %13 = tpu.matmul %10, %12, %cst {dimension_numbers = #tpu.dot_dimension_numbers<[2], [1], [1], [2], [0, 0, 0, 1, 1, 2], [0], [0]>} : vector<4x8x32xbf16>, vector<4x32x8xbf16>, vector<4x8x8xf32> -> vector<4x8x8xf32>
    "tpu.trace_stop"() : () -> ()
    %c0_11 = arith.constant 0 : index
    %c0_12 = arith.constant 0 : index
    %c0_13 = arith.constant 0 : index
    %c0_14 = arith.constant 0 : index
    %14 = vector.load %arg5[%c0_11, %c0_12, %c0_13, %c0_14] : memref<3x4x1x8xf32, #tpu.memory_space<vmem>>, vector<1x4x1x8xf32>
    %15 = vector.shape_cast %14 : vector<1x4x1x8xf32> to vector<4x1x8xf32>
    %16 = vector.broadcast %15 : vector<4x1x8xf32> to vector<4x8x8xf32>
    %17 = arith.addf %13, %16 : vector<4x8x8xf32>
    %c1 = arith.constant 1 : index
    %c0_15 = arith.constant 0 : index
    %c0_16 = arith.constant 0 : index
    %c0_17 = arith.constant 0 : index
    %18 = vector.load %arg4[%c1, %c0_15, %c0_16, %c0_17] : memref<3x4x32x8xbf16, #tpu.memory_space<vmem>>, vector<1x4x32x8xbf16>
    %19 = vector.shape_cast %18 : vector<1x4x32x8xbf16> to vector<4x32x8xbf16>
    "tpu.trace_start"() <{level = 10 : i32, message = "hse,hed->hsd"}> : () -> ()
    %cst_18 = arith.constant dense<0.000000e+00> : vector<4x8x8xf32>
    %20 = tpu.matmul %10, %19, %cst_18 {dimension_numbers = #tpu.dot_dimension_numbers<[2], [1], [1], [2], [0, 0, 0, 1, 1, 2], [0], [0]>} : vector<4x8x32xbf16>, vector<4x32x8xbf16>, vector<4x8x8xf32> -> vector<4x8x8xf32>
    "tpu.trace_stop"() : () -> ()
    %c1_19 = arith.constant 1 : index
    %c0_20 = arith.constant 0 : index
    %c0_21 = arith.constant 0 : index
    %c0_22 = arith.constant 0 : index
    %21 = vector.load %arg5[%c1_19, %c0_20, %c0_21, %c0_22] : memref<3x4x1x8xf32, #tpu.memory_space<vmem>>, vector<1x4x1x8xf32>
    %22 = vector.shape_cast %21 : vector<1x4x1x8xf32> to vector<4x1x8xf32>
    %23 = vector.broadcast %22 : vector<4x1x8xf32> to vector<4x8x8xf32>
    %24 = arith.addf %20, %23 : vector<4x8x8xf32>
    %c2 = arith.constant 2 : index
    %c0_23 = arith.constant 0 : index
    %c0_24 = arith.constant 0 : index
    %c0_25 = arith.constant 0 : index
    %25 = vector.load %arg4[%c2, %c0_23, %c0_24, %c0_25] : memref<3x4x32x8xbf16, #tpu.memory_space<vmem>>, vector<1x4x32x8xbf16>
    %26 = vector.shape_cast %25 : vector<1x4x32x8xbf16> to vector<4x32x8xbf16>
    "tpu.trace_start"() <{level = 10 : i32, message = "hse,hed->hsd"}> : () -> ()
    %cst_26 = arith.constant dense<0.000000e+00> : vector<4x8x8xf32>
    %27 = tpu.matmul %10, %26, %cst_26 {dimension_numbers = #tpu.dot_dimension_numbers<[2], [1], [1], [2], [0, 0, 0, 1, 1, 2], [0], [0]>} : vector<4x8x32xbf16>, vector<4x32x8xbf16>, vector<4x8x8xf32> -> vector<4x8x8xf32>
    "tpu.trace_stop"() : () -> ()
    %c2_27 = arith.constant 2 : index
    %c0_28 = arith.constant 0 : index
    %c0_29 = arith.constant 0 : index
    %c0_30 = arith.constant 0 : index
    %28 = vector.load %arg5[%c2_27, %c0_28, %c0_29, %c0_30] : memref<3x4x1x8xf32, #tpu.memory_space<vmem>>, vector<1x4x1x8xf32>
    %29 = vector.shape_cast %28 : vector<1x4x1x8xf32> to vector<4x1x8xf32>
    %30 = vector.broadcast %29 : vector<4x1x8xf32> to vector<4x8x8xf32>
    %31 = arith.addf %27, %30 : vector<4x8x8xf32>
    %32 = arith.truncf %17 : vector<4x8x8xf32> to vector<4x8x8xbf16>
    %33 = arith.truncf %24 : vector<4x8x8xf32> to vector<4x8x8xbf16>
    "tpu.trace_start"() <{level = 10 : i32, message = "hqd,hkd->hqk"}> : () -> ()
    %cst_31 = arith.constant dense<0.000000e+00> : vector<4x8x8xf32>
    %34 = tpu.matmul %32, %33, %cst_31 {dimension_numbers = #tpu.dot_dimension_numbers<[2], [2], [1], [1], [0, 0, 0, 1, 1, 1], [0], [0]>} : vector<4x8x8xbf16>, vector<4x8x8xbf16>, vector<4x8x8xf32> -> vector<4x8x8xf32>
    "tpu.trace_stop"() : () -> ()
    %cst_32 = arith.constant 0.353553385 : f32
    %35 = vector.broadcast %cst_32 : f32 to vector<4x8x8xf32>
    %36 = arith.mulf %34, %35 : vector<4x8x8xf32>
    %37 = vector.shape_cast %6 : vector<8x8xf32> to vector<1x8x8xf32>
    %38 = vector.broadcast %37 : vector<1x8x8xf32> to vector<4x8x8xf32>
    %39 = arith.addf %36, %38 : vector<4x8x8xf32>
    %cst_33 = arith.constant dense<0xFF800000> : vector<4x8xf32>
    %40 = vector.multi_reduction <maximumf>, %39, %cst_33 [2] : vector<4x8x8xf32> to vector<4x8xf32>
    %41 = vector.shape_cast %40 : vector<4x8xf32> to vector<4x8x1xf32>
    %42 = vector.broadcast %41 : vector<4x8x1xf32> to vector<4x8x8xf32>
    %43 = arith.subf %39, %42 : vector<4x8x8xf32>
    %44 = math.exp %43 : vector<4x8x8xf32>
    %cst_34 = arith.constant dense<0.000000e+00> : vector<4x8xf32>
    %45 = vector.multi_reduction <add>, %44, %cst_34 [2] : vector<4x8x8xf32> to vector<4x8xf32>
    %46 = vector.shape_cast %45 : vector<4x8xf32> to vector<4x8x1xf32>
    %47 = tpu.reciprocal %46 {approx = true} : vector<4x8x1xf32> -> vector<4x8x1xf32>
    %48 = vector.broadcast %47 : vector<4x8x1xf32> to vector<4x8x8xf32>
    %49 = arith.mulf %44, %48 : vector<4x8x8xf32>
    %50 = arith.truncf %49 : vector<4x8x8xf32> to vector<4x8x8xbf16>
    %51 = arith.truncf %31 : vector<4x8x8xf32> to vector<4x8x8xbf16>
    "tpu.trace_start"() <{level = 10 : i32, message = "hqk,hkd->hqd"}> : () -> ()
    %cst_35 = arith.constant dense<0.000000e+00> : vector<4x8x8xf32>
    %52 = tpu.matmul %50, %51, %cst_35 {dimension_numbers = #tpu.dot_dimension_numbers<[2], [1], [1], [2], [0, 0, 0, 1, 1, 2], [0], [0]>} : vector<4x8x8xbf16>, vector<4x8x8xbf16>, vector<4x8x8xf32> -> vector<4x8x8xf32>
    "tpu.trace_stop"() : () -> ()
    %53 = arith.truncf %52 : vector<4x8x8xf32> to vector<4x8x8xbf16>
    %c0_36 = arith.constant 0 : index
    %c0_37 = arith.constant 0 : index
    %c0_38 = arith.constant 0 : index
    %54 = vector.load %arg6[%c0_36, %c0_37, %c0_38] : memref<4x8x32xbf16, #tpu.memory_space<vmem>>, vector<4x8x32xbf16>
    "tpu.trace_start"() <{level = 10 : i32, message = "hsd,hdo->hso"}> : () -> ()
    %cst_39 = arith.constant dense<0.000000e+00> : vector<4x8x32xf32>
    %55 = tpu.matmul %53, %54, %cst_39 {dimension_numbers = #tpu.dot_dimension_numbers<[2], [1], [1], [2], [0, 0, 0, 1, 1, 2], [0], [0]>} : vector<4x8x8xbf16>, vector<4x8x32xbf16>, vector<4x8x32xf32> -> vector<4x8x32xf32>
    "tpu.trace_stop"() : () -> ()
    %cst_40 = arith.constant dense<0.000000e+00> : vector<8x32xf32>
    %56 = vector.multi_reduction <add>, %55, %cst_40 [0] : vector<4x8x32xf32> to vector<8x32xf32>
    %c0_41 = arith.constant 0 : index
    %c0_42 = arith.constant 0 : index
    %57 = vector.load %arg7[%c0_41, %c0_42] : memref<1x32xf32, #tpu.memory_space<vmem>>, vector<1x32xf32>
    %58 = vector.broadcast %57 : vector<1x32xf32> to vector<8x32xf32>
    %59 = arith.addf %56, %58 : vector<8x32xf32>
    %60 = arith.addf %1, %59 : vector<8x32xf32>
    %cst_43 = arith.constant dense<0.000000e+00> : vector<8xf32>
    %61 = vector.multi_reduction <add>, %60, %cst_43 [1] : vector<8x32xf32> to vector<8xf32>
    %62 = vector.shape_cast %61 : vector<8xf32> to vector<8x1xf32>
    %cst_44 = arith.constant 3.200000e+01 : f32
    %63 = vector.broadcast %cst_44 : f32 to vector<8x1xf32>
    %64 = arith.divf %62, %63 : vector<8x1xf32>
    %65 = vector.broadcast %64 : vector<8x1xf32> to vector<8x32xf32>
    %66 = arith.subf %60, %65 : vector<8x32xf32>
    %67 = arith.mulf %66, %66 : vector<8x32xf32>
    %cst_45 = arith.constant dense<0.000000e+00> : vector<8xf32>
    %68 = vector.multi_reduction <add>, %67, %cst_45 [1] : vector<8x32xf32> to vector<8xf32>
    %69 = vector.shape_cast %68 : vector<8xf32> to vector<8x1xf32>
    %cst_46 = arith.constant 3.200000e+01 : f32
    %70 = vector.broadcast %cst_46 : f32 to vector<8x1xf32>
    %71 = arith.divf %69, %70 : vector<8x1xf32>
    %72 = vector.broadcast %64 : vector<8x1xf32> to vector<8x32xf32>
    %73 = arith.subf %60, %72 : vector<8x32xf32>
    %cst_47 = arith.constant 9.99999974E-6 : f32
    %74 = vector.broadcast %cst_47 : f32 to vector<8x1xf32>
    %75 = arith.addf %71, %74 : vector<8x1xf32>
    %76 = math.rsqrt %75 : vector<8x1xf32>
    %77 = vector.broadcast %76 : vector<8x1xf32> to vector<8x32xf32>
    %78 = arith.mulf %73, %77 : vector<8x32xf32>
    %c0_48 = arith.constant 0 : index
    %c0_49 = arith.constant 0 : index
    %79 = vector.load %arg8[%c0_48, %c0_49] : memref<1x32xf32, #tpu.memory_space<vmem>>, vector<1x32xf32>
    %80 = vector.broadcast %79 : vector<1x32xf32> to vector<8x32xf32>
    %81 = arith.mulf %78, %80 : vector<8x32xf32>
    %c0_50 = arith.constant 0 : index
    %c0_51 = arith.constant 0 : index
    %82 = vector.load %arg9[%c0_50, %c0_51] : memref<1x32xf32, #tpu.memory_space<vmem>>, vector<1x32xf32>
    %83 = vector.broadcast %82 : vector<1x32xf32> to vector<8x32xf32>
    %84 = arith.addf %81, %83 : vector<8x32xf32>
    %85 = arith.truncf %84 : vector<8x32xf32> to vector<8x32xbf16>
    %c0_52 = arith.constant 0 : index
    %c0_53 = arith.constant 0 : index
    %86 = vector.load %arg10[%c0_52, %c0_53] : memref<32x64xbf16, #tpu.memory_space<vmem>>, vector<32x64xbf16>
    %cst_54 = arith.constant dense<0.000000e+00> : vector<8x64xf32>
    %87 = tpu.matmul %85, %86, %cst_54 {dimension_numbers = #tpu.dot_dimension_numbers<[1], [0], [0], [1], [0, 0, 1, 1], [], []>} : vector<8x32xbf16>, vector<32x64xbf16>, vector<8x64xf32> -> vector<8x64xf32>
    %c0_55 = arith.constant 0 : index
    %c0_56 = arith.constant 0 : index
    %88 = vector.load %arg11[%c0_55, %c0_56] : memref<1x64xf32, #tpu.memory_space<vmem>>, vector<1x64xf32>
    %89 = vector.broadcast %88 : vector<1x64xf32> to vector<8x64xf32>
    %90 = arith.addf %87, %89 : vector<8x64xf32>
    %cst_57 = arith.constant 0.000000e+00 : f32
    %91 = vector.broadcast %cst_57 : f32 to vector<8x64xf32>
    %92 = arith.maximumf %90, %91 : vector<8x64xf32>
    %93 = arith.truncf %92 : vector<8x64xf32> to vector<8x64xbf16>
    %c0_58 = arith.constant 0 : index
    %c0_59 = arith.constant 0 : index
    %94 = vector.load %arg12[%c0_58, %c0_59] : memref<64x32xbf16, #tpu.memory_space<vmem>>, vector<64x32xbf16>
    %cst_60 = arith.constant dense<0.000000e+00> : vector<8x32xf32>
    %95 = tpu.matmul %93, %94, %cst_60 {dimension_numbers = #tpu.dot_dimension_numbers<[1], [0], [0], [1], [0, 0, 1, 1], [], []>} : vector<8x64xbf16>, vector<64x32xbf16>, vector<8x32xf32> -> vector<8x32xf32>
    %c0_61 = arith.constant 0 : index
    %c0_62 = arith.constant 0 : index
    %96 = vector.load %arg13[%c0_61, %c0_62] : memref<1x32xf32, #tpu.memory_space<vmem>>, vector<1x32xf32>
    %97 = vector.broadcast %96 : vector<1x32xf32> to vector<8x32xf32>
    %98 = arith.addf %95, %97 : vector<8x32xf32>
    %99 = arith.addf %84, %98 : vector<8x32xf32>
    %cst_63 = arith.constant dense<0.000000e+00> : vector<8xf32>
    %100 = vector.multi_reduction <add>, %99, %cst_63 [1] : vector<8x32xf32> to vector<8xf32>
    %101 = vector.shape_cast %100 : vector<8xf32> to vector<8x1xf32>
    %cst_64 = arith.constant 3.200000e+01 : f32
    %102 = vector.broadcast %cst_64 : f32 to vector<8x1xf32>
    %103 = arith.divf %101, %102 : vector<8x1xf32>
    %104 = vector.broadcast %103 : vector<8x1xf32> to vector<8x32xf32>
    %105 = arith.subf %99, %104 : vector<8x32xf32>
    %106 = arith.mulf %105, %105 : vector<8x32xf32>
    %cst_65 = arith.constant dense<0.000000e+00> : vector<8xf32>
    %107 = vector.multi_reduction <add>, %106, %cst_65 [1] : vector<8x32xf32> to vector<8xf32>
    %108 = vector.shape_cast %107 : vector<8xf32> to vector<8x1xf32>
    %cst_66 = arith.constant 3.200000e+01 : f32
    %109 = vector.broadcast %cst_66 : f32 to vector<8x1xf32>
    %110 = arith.divf %108, %109 : vector<8x1xf32>
    %111 = vector.broadcast %103 : vector<8x1xf32> to vector<8x32xf32>
    %112 = arith.subf %99, %111 : vector<8x32xf32>
    %cst_67 = arith.constant 9.99999974E-6 : f32
    %113 = vector.broadcast %cst_67 : f32 to vector<8x1xf32>
    %114 = arith.addf %110, %113 : vector<8x1xf32>
    %115 = math.rsqrt %114 : vector<8x1xf32>
    %116 = vector.broadcast %115 : vector<8x1xf32> to vector<8x32xf32>
    %117 = arith.mulf %112, %116 : vector<8x32xf32>
    %c0_68 = arith.constant 0 : index
    %c0_69 = arith.constant 0 : index
    %118 = vector.load %arg14[%c0_68, %c0_69] : memref<1x32xf32, #tpu.memory_space<vmem>>, vector<1x32xf32>
    %119 = vector.broadcast %118 : vector<1x32xf32> to vector<8x32xf32>
    %120 = arith.mulf %117, %119 : vector<8x32xf32>
    %c0_70 = arith.constant 0 : index
    %c0_71 = arith.constant 0 : index
    %121 = vector.load %arg15[%c0_70, %c0_71] : memref<1x32xf32, #tpu.memory_space<vmem>>, vector<1x32xf32>
    %122 = vector.broadcast %121 : vector<1x32xf32> to vector<8x32xf32>
    %123 = arith.addf %120, %122 : vector<8x32xf32>
    %c0_72 = arith.constant 0 : index
    %c0_73 = arith.constant 0 : index
    %c0_74 = arith.constant 0 : index
    %124 = vector.load %arg16[%c0_72, %c0_73, %c0_74] : memref<1x8x32xf32, #tpu.memory_space<vmem>>, vector<1x8x32xf32>
    %125 = vector.shape_cast %124 : vector<1x8x32xf32> to vector<8x32xf32>
    %126 = vector.shape_cast %123 : vector<8x32xf32> to vector<1x8x32xf32>
    tpu.vector_store %arg16[%c0_72, %c0_73, %c0_74], %126 {strides = array<i32>} : memref<1x8x32xf32, #tpu.memory_space<vmem>>, vector<1x8x32xf32>,
    return
  }
  func.func @transform_0(%arg0: i32) -> (i32, i32, i32) {
    %c0_i32 = arith.constant 0 : i32
    %c0_i32_0 = arith.constant 0 : i32
    %c0_i32_1 = arith.constant 0 : i32
    return %arg0, %c0_i32, %c0_i32_0 : i32, i32, i32
  }
  func.func @transform_1(%arg0: i32) -> (i32, i32) {
    %c0_i32 = arith.constant 0 : i32
    %c0_i32_0 = arith.constant 0 : i32
    %c0_i32_1 = arith.constant 0 : i32
    return %c0_i32, %c0_i32_0 : i32, i32
  }
  func.func @transform_2(%arg0: i32) -> (i32, i32, i32) {
    %c0_i32 = arith.constant 0 : i32
    %c0_i32_0 = arith.constant 0 : i32
    %c0_i32_1 = arith.constant 0 : i32
    return %arg0, %c0_i32, %c0_i32_0 : i32, i32, i32
  }
  func.func @transform_3(%arg0: i32) -> (i32, i32, i32, i32) {
    %c0_i32 = arith.constant 0 : i32
    %c0_i32_0 = arith.constant 0 : i32
    %c0_i32_1 = arith.constant 0 : i32
    %c0_i32_2 = arith.constant 0 : i32
    %c0_i32_3 = arith.constant 0 : i32
    return %c0_i32, %c0_i32_0, %c0_i32_1, %c0_i32_2 : i32, i32, i32, i32
  }
  func.func @transform_4(%arg0: i32) -> (i32, i32, i32, i32) {
    %c0_i32 = arith.constant 0 : i32
    %c0_i32_0 = arith.constant 0 : i32
    %c0_i32_1 = arith.constant 0 : i32
    %c0_i32_2 = arith.constant 0 : i32
    %c0_i32_3 = arith.constant 0 : i32
    return %c0_i32, %c0_i32_0, %c0_i32_1, %c0_i32_2 : i32, i32, i32, i32
  }
  func.func @transform_5(%arg0: i32) -> (i32, i32, i32) {
    %c0_i32 = arith.constant 0 : i32
    %c0_i32_0 = arith.constant 0 : i32
    %c0_i32_1 = arith.constant 0 : i32
    %c0_i32_2 = arith.constant 0 : i32
    return %c0_i32, %c0_i32_0, %c0_i32_1 : i32, i32, i32
  }
  func.func @transform_6(%arg0: i32) -> (i32, i32) {
    %c0_i32 = arith.constant 0 : i32
    %c0_i32_0 = arith.constant 0 : i32
    %c0_i32_1 = arith.constant 0 : i32
    return %c0_i32, %c0_i32_0 : i32, i32
  }
  func.func @transform_7(%arg0: i32) -> (i32, i32) {
    %c0_i32 = arith.constant 0 : i32
    %c0_i32_0 = arith.constant 0 : i32
    %c0_i32_1 = arith.constant 0 : i32
    return %c0_i32, %c0_i32_0 : i32, i32
  }
  func.func @transform_8(%arg0: i32) -> (i32, i32) {
    %c0_i32 = arith.constant 0 : i32
    %c0_i32_0 = arith.constant 0 : i32
    %c0_i32_1 = arith.constant 0 : i32
    return %c0_i32, %c0_i32_0 : i32, i32
  }
  func.func @transform_9(%arg0: i32) -> (i32, i32) {
    %c0_i32 = arith.constant 0 : i32
    %c0_i32_0 = arith.constant 0 : i32
    %c0_i32_1 = arith.constant 0 : i32
    return %c0_i32, %c0_i32_0 : i32, i32
  }
  func.func @transform_10(%arg0: i32) -> (i32, i32) {
    %c0_i32 = arith.constant 0 : i32
    %c0_i32_0 = arith.constant 0 : i32
    %c0_i32_1 = arith.constant 0 : i32
    return %c0_i32, %c0_i32_0 : i32, i32
  }
  func.func @transform_11(%arg0: i32) -> (i32, i32) {
    %c0_i32 = arith.constant 0 : i32
    %c0_i32_0 = arith.constant 0 : i32
    %c0_i32_1 = arith.constant 0 : i32
    return %c0_i32, %c0_i32_0 : i32, i32
  }
  func.func @transform_12(%arg0: i32) -> (i32, i32) {
    %c0_i32 = arith.constant 0 : i32
    %c0_i32_0 = arith.constant 0 : i32
    %c0_i32_1 = arith.constant 0 : i32
    return %c0_i32, %c0_i32_0 : i32, i32
  }
  func.func @transform_13(%arg0: i32) -> (i32, i32) {
    %c0_i32 = arith.constant 0 : i32
    %c0_i32_0 = arith.constant 0 : i32
    %c0_i32_1 = arith.constant 0 : i32
    return %c0_i32, %c0_i32_0 : i32, i32
  }
  func.func @transform_14(%arg0: i32) -> (i32, i32) {
    %c0_i32 = arith.constant 0 : i32
    %c0_i32_0 = arith.constant 0 : i32
    %c0_i32_1 = arith.constant 0 : i32
    return %c0_i32, %c0_i32_0 : i32, i32
  }
  func.func @transform_15(%arg0: i32) -> (i32, i32, i32) {
    %c0_i32 = arith.constant 0 : i32
    %c0_i32_0 = arith.constant 0 : i32
    %c0_i32_1 = arith.constant 0 : i32
    return %arg0, %c0_i32, %c0_i32_0 : i32, i32, i32
  }
}

</mosaic_0001>

<bundles_post_ra>
// kernel: tpu_custom_call.1
= control target key start
LH: loop header
LB: loop body
LE: loop exit
PB: predicated region body
PF: predicated region fallthrough
CT: control target
= control target key end

     0   :  { %s3283_s0 = inlined_call_operand.vmem [shape: f32[2,8,32], index: 0, kind: input, shape index: {}]   ;;  %s3284_s1 = inlined_call_operand.vmem [shape: f32[8,8], index: 1, kind: input, shape index: {}]   ;;  %s3285_s2 = inlined_call_operand.vmem [shape: f32[2,1,8], index: 2, kind: input, shape index: {}]   ;;  %s3286_s3 = inlined_call_operand.vmem [shape: bf16[3,4,32,8], index: 3, kind: input, shape index: {}]   ;;  %s3287_s4 = inlined_call_operand.vmem [shape: f32[3,4,1,8], index: 4, kind: input, shape index: {}]   ;;  %s3288_s5 = inlined_call_operand.vmem [shape: bf16[4,8,32], index: 5, kind: input, shape index: {}]   ;;  %s3289_s6 = inlined_call_operand.vmem [shape: f32[1,32], index: 6, kind: input, shape index: {}]   ;;  %s3290_s7 = inlined_call_operand.vmem [shape: f32[1,32], index: 7, kind: input, shape index: {}]   ;;  %s3291_s8 = inlined_call_operand.vmem [shape: f32[1,32], index: 8, kind: input, shape index: {}]   ;;  %s3292_s9 = inlined_call_operand.vmem [shape: bf16[32,64], index: 9, kind: input, shape index: {}]   ;;  %s3293_s10 = inlined_call_operand.vmem [shape: f32[1,64], index: 10, kind: input, shape index: {}]   ;;  %s3294_s11 = inlined_call_operand.vmem [shape: bf16[64,32], index: 11, kind: input, shape index: {}]   ;;  %s3295_s12 = inlined_call_operand.vmem [shape: f32[1,32], index: 12, kind: input, shape index: {}]   ;;  %s3296_s13 = inlined_call_operand.vmem [shape: f32[1,32], index: 13, kind: input, shape index: {}]   ;;  %s3297_s14 = inlined_call_operand.vmem [shape: f32[1,32], index: 14, kind: input, shape index: {}]   ;;  %s3298_s15 = inlined_call_operand.hbm [shape: f32[2,8,32], index: 15, kind: output, shape index: {}]  }
   0x1   :  { %3302 = sst [smem:[#allocation8_spill]] %s3283_s0 }
   0x2   :  { %3303 = sst [smem:[#allocation9_spill]] %s3284_s1 }
   0x3   :  { %3304 = sst [smem:[#allocation10_spill]] %s3285_s2 }
   0x4   :  { %20 = vsyncpa [#allocation3], 0 }
   0x5   :  { %22 = vsyncpa [#allocation3 + $0x1], 0  ;;  %s2841_s18 = smov 0   ;;  %s2843_s19 = smov 0  }
   0x6   :  { %s2845_s20 = smov 0   ;;  %s2847_s21 = smov 0  }
   0x7 LB: > { %3305 = sst [smem:[#allocation5_spill]] %s2752_s20  ;;  %s2862_s22 = sadd.s32 4294967295, %s2756_s21   ;;  %s2756_s21 = sphi %s2847_s21, %s3313_s21   ;;  %s2752_s20 = sphi %s2845_s20, %s3315_s20   ;;  %s2748_s19 = sphi %s2843_s19, %s3317_s19   ;;  %s2744_s18 = sphi %s2841_s18, %s3316_s18  }
   0x8   : > { %s2221_s23 = sadd.s32 4294967294, %s2756_s21   ;;  %s2866_s24 = sadd.s32 1, %s2756_s21  }
   0x9   : > { %3306 = sst [smem:[#allocation6_spill]] %s2866_s24  ;;  %s360_s25 = sadd.s32 1, %s2752_s20 }
   0xa   : > { %s357_s26 = ssub.s32 %s2756_s21, %s2866_s24  ;;  %p370_p0 = scmp.ne.s32.totalorder %s2752_s20, %s2748_s19 }
   0xb   : > { %p358_p1 = scmp.eq.s32.totalorder %s357_s26, 0  ;;  %p371_p2 = scmp.eq.s32.totalorder %s2862_s22, 1 }
   0xc   : > { %p376_p3 = scmp.ne.s32.totalorder %s2748_s19, %s2744_s18  ;;  %p377_p4 = scmp.eq.s32.totalorder %s2221_s23, 1 }
   0xd   : > { %s2877_s27 = scalar_select %p358_p1, %s2752_s20, %s360_s25  }
   0xe   : > { %p2879_p5 = por %p371_p2, %p370_p0  ;;  %p2883_p6 = por %p377_p4, %p376_p3 }
   0xf   : > { %3307 = sst [smem:[#allocation7_spill]] %s2877_s27  ;;  %p2224_p7 = scmp.ge.s32.totalorder %s2756_s21, 1 }
  0x10   : > { %p447_p8 = scmp.lt.s32.totalorder %s2756_s21, 3 }
  0x12   : > { %p448_p9 = pnand %p2224_p7, %p447_p8 }
  0x13   : > { %v2644_v0 = vld [vmem:[%s3286_s3] sm:$0xff] (!%p448_p9)   ;;  %v2758_v1 = vmov (!%p448_p9), 0.0   ;;  %v2645_v2 = vld [vmem:[%s3286_s3 + $0x10] sm:$0xff] (!%p448_p9)   ;;  %v2646_v3 = vld [vmem:[%s3286_s3 + $0x8] sm:$0xff] (!%p448_p9)   ;;  %vm2759_vm0 = vmmov (!%p448_p9), 0   ;;  %p497_p10 = scmp.lt.s32.totalorder (!%p448_p9), %s2862_s22, 1 }
  0x14   : > { %451 = sbr.rel (%p448_p9) target bundleno = 2327 (0x917), region = 80  ;;  %2415 = vmatprep.subr.bf16.mxu0 (!%p448_p9), %v2758_v1  ;;  %2423 = vmatprep.subr.bf16.mxu1 (!%p448_p9), %v2758_v1  ;;  %v2647_v4 = vld [vmem:[%s3286_s3 + $0x18] sm:$0xff] (!%p448_p9)   ;;  %v2648_v5 = vld [vmem:[%s3286_s3 + $0x20] sm:$0xff] (!%p448_p9)   ;;  %s3310_s0 = sld [smem:[#allocation8_spill]] (!%p448_p9)  ;;  %v2649_v6 = vld [vmem:[%s3286_s3 + $0x30] sm:$0xff] (!%p448_p9)   ;;  %vm572_vm1 = vcmask (!%p448_p9), 261120  }
  0x15   : > { %2416 = vmatpush3.bf16.msra.mxu0 (!%p448_p9), %v2644_v0  ;;  %2419 = vmatprep.mubr.msk.bf16.mxu0 (!%p448_p9), %vm2759_vm0, %v2758_v1  ;;  %v2650_v9 = vld [vmem:[%s3286_s3 + $0x28] sm:$0xff] (!%p448_p9)   ;;  %v2651_v10 = vld [vmem:[%s3286_s3 + $0x38] sm:$0xff] (!%p448_p9)   ;;  %v2652_v11 = vld [vmem:[%s3286_s3 + $0x40] sm:$0xff] (!%p448_p9)   ;;  %vm1288_vm2 = vcmask (!%p448_p9), 64512   ;;  %vm1536_vm3 = vcmask (!%p448_p9), 1043456   ;;  %s3311_s2 = sld [smem:[#allocation10_spill]] (!%p448_p9) }
  0x16   : > { %2424 = vmatpush3.bf16.msra.mxu1 (!%p448_p9), %v2645_v2  ;;  %2417 = vmatprep.subr.bf16.mxu0 (!%p448_p9), %v2758_v1  ;;  %v2653_v12 = vld [vmem:[%s3286_s3 + $0x50] sm:$0xff] (!%p448_p9)   ;;  %v2654_v13 = vld [vmem:[%s3286_s3 + $0x48] sm:$0xff] (!%p448_p9)   ;;  %v2655_v14 = vld [vmem:[%s3286_s3 + $0x58] sm:$0xff] (!%p448_p9)   ;;  %s3312_s1 = sld [smem:[#allocation9_spill]] (!%p448_p9)  ;;  %vm2064_vm4 = vcmask (!%p448_p9), 523264   ;;  %s2344_s20 = sshll.u32 (!%p448_p9), %s2862_s22, 7 }
  0x17   : > { %2425 = vmatprep.subr.bf16.mxu1 (!%p448_p9), %v2758_v1  ;;  %2427 = vmatprep.mubr.msk.bf16.mxu1 (!%p448_p9), %vm2759_vm0, %v2758_v1  ;;  %v2656_v15 = vld [vmem:[%s3286_s3 + $0x60] sm:$0xff] (!%p448_p9)   ;;  %v2657_v16 = vld [vmem:[%s3286_s3 + $0x70] sm:$0xff] (!%p448_p9)   ;;  %v2658_v17 = vld [vmem:[%s3286_s3 + $0x68] sm:$0xff] (!%p448_p9)  }
  0x18   : > { %v2659_v18 = vld [vmem:[%s3286_s3 + $0x78] sm:$0xff] (!%p448_p9)   ;;  %v2660_v19 = vld [vmem:[%s3286_s3 + $0x80] sm:$0xff] (!%p448_p9)   ;;  %v2661_v20 = vld [vmem:[%s3286_s3 + $0x90] sm:$0xff] (!%p448_p9)  }
  0x19   : > { %2418 = vmatpush3.bf16.msra.mxu0 (!%p448_p9), %v2646_v3  ;;  %v2662_v21 = vld [vmem:[%s3286_s3 + $0x88] sm:$0xff] (!%p448_p9)   ;;  %v2663_v22 = vld [vmem:[%s3286_s3 + $0x98] sm:$0xff] (!%p448_p9)   ;;  %v2664_v23 = vld [vmem:[%s3286_s3 + $0xa0] sm:$0xff] (!%p448_p9)  }
  0x1a   : > { %2426 = vmatpush3.bf16.msra.mxu1 (!%p448_p9), %v2647_v4  ;;  %2431 = vmatprep.subr.bf16.mxu0 (!%p448_p9), %v2758_v1  ;;  %v2665_v24 = vld [vmem:[%s3286_s3 + $0xb0] sm:$0xff] (!%p448_p9)   ;;  %v2666_v25 = vld [vmem:[%s3286_s3 + $0xa8] sm:$0xff] (!%p448_p9)   ;;  %v2667_v26 = vld [vmem:[%s3286_s3 + $0xb8] sm:$0xff] (!%p448_p9)  }
  0x1b   : > { %s2911_s17 = scalar_select %p497_p10, %s2862_s22, 1  ;;  %2439 = vmatprep.subr.bf16.mxu1 %v2758_v1  ;;  %v2264_v43 = vld [vmem:[%s3287_s4 + $0x4] ss:$0 sm:$0xff]  ;;  %v2265_v44 = vld [vmem:[%s3287_s4 + $0x5] ss:$0 sm:$0xff] }
  0x1c   : > { %v2228_v57 = vld [vmem:[%s3287_s4] ss:$0 sm:$0xff]  ;;  %v2229_v58 = vld [vmem:[%s3287_s4 + $0x1] ss:$0 sm:$0xff]  ;;  %v2266_v61 = vld [vmem:[%s3287_s4 + $0x6] ss:$0 sm:$0xff] }
  0x1d   : > { %s2226_s23 = sshll.u32 %s2911_s17, 3  ;;  %v2267_v62 = vld [vmem:[%s3287_s4 + $0x7] ss:$0 sm:$0xff]  ;;  %s503_s24 = scalar_lea.vmem %s3311_s2, %s2911_s17 }
  0x1e   : > { %s500_s30 = scalar_lea.vmem %s3310_s0, %s2226_s23  ;;  %s494_s23 = sand.u32 1, %s2748_s19  }
  0x1f   : > { %v2924_v7 = vld [vmem:[%s500_s30] sm:$0xff]  ;;  %s2225_s25 = sshll.u32 %s494_s23, 3  ;;  %s3240_s2 = scalar_lea.hbm %s3298_s15, %s2344_s20 }
  0x20   : > { %v2929_v8 = vpack.c.bf16 %v2924_v7, %v2924_v7  ;;  %s496_s27 = scalar_lea.vmem [#allocation2], %s2225_s25  ;;  %s2140_s17 = scalar_lea.sflag [#allocation3], %s494_s23 }
  0x21   : > { %s2760_s22 = smov [#allocation2]  }
  0x22   : > { %2420 = vmatmul.mubr.msk.bf16.vlgmr.msra.gmra.mrb[0].mxu0 %vm572_vm1, %v2929_v8  ;;  %2428 = vmatmul.mubr.msk.bf16.vlgmr.msra.gmra.mrb[0].mxu1 %vm572_vm1, %v2929_v8  ;;  %s2698_s25 = sshll.u32 %s2760_s22, 4  ;;  %s2699_s25 = int_to_ptr.vmem [resolvable:$false] %s2698_s25 }
  0x23   : > { %2432 = vmatpush3.bf16.msra.mxu0 %v2648_v5  ;;  %2440 = vmatpush3.bf16.msra.mxu1 %v2649_v6  ;;  %s2700_s30 = scalar_lea.vmem %s2699_s25, 256 }
  0x24   : > { %2433 = vmatprep.subr.bf16.mxu0 %v2758_v1  ;;  %2441 = vmatprep.subr.bf16.mxu1 %v2758_v1 }
  0x25   : > { %2435 = vmatprep.mubr.msk.bf16.mxu0 %vm2759_vm0, %v2758_v1  ;;  %2443 = vmatprep.mubr.msk.bf16.mxu1 %vm2759_vm0, %v2758_v1 }
  0x27   : > { %2434 = vmatpush3.bf16.msra.mxu0 %v2650_v9  ;;  %2442 = vmatpush3.bf16.msra.mxu1 %v2651_v10 }
  0x28   : > { %2447 = vmatprep.subr.bf16.mxu0 %v2758_v1  ;;  %2455 = vmatprep.subr.bf16.mxu1 %v2758_v1 }
  0x2a   : > { %2436 = vmatmul.mubr.msk.bf16.vlgmr.msra.gmra.mrb[4].mxu0 %vm572_vm1, %v2929_v8  ;;  %2444 = vmatmul.mubr.msk.bf16.vlgmr.msra.gmra.mrb[4].mxu1 %vm572_vm1, %v2929_v8 }
  0x2b   : > { %2448 = vmatpush3.bf16.msra.mxu0 %v2652_v11  ;;  %2456 = vmatpush3.bf16.msra.mxu1 %v2653_v12 }
  0x2c   : > { %2449 = vmatprep.subr.bf16.mxu0 %v2758_v1  ;;  %2457 = vmatprep.subr.bf16.mxu1 %v2758_v1 }
  0x2d   : > { %2451 = vmatprep.mubr.msk.bf16.mxu0 %vm2759_vm0, %v2758_v1  ;;  %2459 = vmatprep.mubr.msk.bf16.mxu1 %vm2759_vm0, %v2758_v1 }
  0x2f   : > { %2450 = vmatpush3.bf16.msra.mxu0 %v2654_v13  ;;  %2458 = vmatpush3.bf16.msra.mxu1 %v2655_v14 }
  0x30   : > { %2463 = vmatprep.subr.bf16.mxu0 %v2758_v1  ;;  %2471 = vmatprep.subr.bf16.mxu1 %v2758_v1 }
  0x32   : > { %2452 = vmatmul.mubr.msk.bf16.vlgmr.msra.gmra.mrb[8].mxu0 %vm572_vm1, %v2929_v8  ;;  %2460 = vmatmul.mubr.msk.bf16.vlgmr.msra.gmra.mrb[8].mxu1 %vm572_vm1, %v2929_v8 }
  0x33   : > { %2464 = vmatpush3.bf16.msra.mxu0 %v2656_v15  ;;  %2472 = vmatpush3.bf16.msra.mxu1 %v2657_v16 }
  0x34   : > { %2465 = vmatprep.subr.bf16.mxu0 %v2758_v1  ;;  %2473 = vmatprep.subr.bf16.mxu1 %v2758_v1 }
  0x35   : > { %2467 = vmatprep.mubr.msk.bf16.mxu0 %vm2759_vm0, %v2758_v1  ;;  %2475 = vmatprep.mubr.msk.bf16.mxu1 %vm2759_vm0, %v2758_v1 }
  0x37   : > { %2466 = vmatpush3.bf16.msra.mxu0 %v2658_v17  ;;  %2474 = vmatpush3.bf16.msra.mxu1 %v2659_v18  ;;  %v2230_v17 = vld [vmem:[%s3287_s4 + $0x2] ss:$0 sm:$0xff]  ;;  %v2231_v18 = vld [vmem:[%s3287_s4 + $0x3] ss:$0 sm:$0xff] }
  0x38   : > { %2479 = vmatprep.subr.bf16.mxu0 %v2758_v1  ;;  %2487 = vmatprep.subr.bf16.mxu1 %v2758_v1 }
  0x3a   : > { %2468 = vmatmul.mubr.msk.bf16.vlgmr.msra.gmra.mrb[12].mxu0 %vm572_vm1, %v2929_v8  ;;  %2476 = vmatmul.mubr.msk.bf16.vlgmr.msra.gmra.mrb[12].mxu1 %vm572_vm1, %v2929_v8 }
  0x3b   : > { %2480 = vmatpush3.bf16.msra.mxu0 %v2660_v19  ;;  %2483 = vmatprep.mubr.msk.bf16.mxu0 %vm2759_vm0, %v2758_v1 }
  0x3c   : > { %2481 = vmatprep.subr.bf16.mxu0 %v2758_v1  ;;  %2491 = vmatprep.mubr.msk.bf16.mxu1 %vm2759_vm0, %v2758_v1 }
  0x3d   : > { %2488 = vmatpush3.bf16.msra.mxu1 %v2661_v20 }
  0x3e   : > { %2489 = vmatprep.subr.bf16.mxu1 %v2758_v1 }
  0x3f   : > { %2482 = vmatpush3.bf16.msra.mxu0 %v2662_v21 }
  0x40   : > { %2495 = vmatprep.subr.bf16.mxu0 %v2758_v1 }
  0x41   : > { %2490 = vmatpush3.bf16.msra.mxu1 %v2663_v22 }
  0x42   : > { %2484 = vmatmul.mubr.msk.bf16.vlgmr.msra.gmra.mrb[16].mxu0 %vm572_vm1, %v2929_v8  ;;  %2503 = vmatprep.subr.bf16.mxu1 %v2758_v1 }
  0x43   : > { %2499 = vmatprep.mubr.msk.bf16.mxu0 %vm2759_vm0, %v2758_v1  ;;  %2496 = vmatpush3.bf16.msra.mxu0 %v2664_v23 }
  0x44   : > { %2492 = vmatmul.mubr.msk.bf16.vlgmr.msra.gmra.mrb[16].mxu1 %vm572_vm1, %v2929_v8  ;;  %2497 = vmatprep.subr.bf16.mxu0 %v2758_v1 }
  0x45   : > { %2504 = vmatpush3.bf16.msra.mxu1 %v2665_v24  ;;  %2507 = vmatprep.mubr.msk.bf16.mxu1 %vm2759_vm0, %v2758_v1 }
  0x46   : > { %2505 = vmatprep.subr.bf16.mxu1 %v2758_v1 }
  0x47   : > { %2498 = vmatpush3.bf16.msra.mxu0 %v2666_v25  ;;  %v2300_v25 = vld [vmem:[%s3287_s4 + $0x8] ss:$0 sm:$0xff] }
  0x48   : > { %2511 = vmatprep.subr.bf16.mxu0 %v2758_v1 }
  0x49   : > { %2506 = vmatpush3.bf16.msra.mxu1 %v2667_v26 }
  0x4a   : > { %2517 = vmatprep.subr.bf16.mxu1 %v2758_v1  ;;  %2500 = vmatmul.mubr.msk.bf16.vlgmr.msra.gmra.mrb[20].mxu0 %vm572_vm1, %v2929_v8 }
  0x4b   : > { %2513 = vmatprep.mubr.msk.bf16.mxu0 %vm2759_vm0, %v2758_v1 }
  0x4c   : > { %2508 = vmatmul.mubr.msk.bf16.vlgmr.msra.gmra.mrb[20].mxu1 %vm572_vm1, %v2929_v8 }
  0x4d   : > { %2519 = vmatprep.mubr.msk.bf16.mxu1 %vm2759_vm0, %v2758_v1 }
  0xf5   : > { %v610_v27 = vpop.f32.mrb[0].mxu0  ;;  %v662_v28 = vpop.f32.mrb[0].mxu1 }
  0xf6   : > { %v2421_v29 = vpop.f32.mrb[1].mxu0  ;;  %v2429_v30 = vpop.f32.mrb[1].mxu1  ;;  %v611_v63 = vadd.f32 %v2228_v57, %v610_v27  ;;  %v663_v0 = vadd.f32 %v2229_v58, %v662_v28  ;;  %v2301_v27 = vld [vmem:[%s3287_s4 + $0x9] ss:$0 sm:$0xff] }
  0xf7   : > { %v613_v31 = vpop.f32.mrb[2].mxu0  ;;  %v665_v32 = vpop.f32.mrb[2].mxu1 }
  0xf8   : > { %v2422_v33 = vpop.f32.mrb[3].mxu0  ;;  %v2430_v34 = vpop.f32.mrb[3].mxu1  ;;  %v1280_v11 = vpack.c.bf16 %v611_v63, %v611_v63  ;;  %v1281_v12 = vpack.c.bf16 %v663_v0, %v663_v0 }
  0xfd   : > { %v714_v35 = vpop.f32.mrb[4].mxu0  ;;  %v766_v36 = vpop.f32.mrb[4].mxu1 }
  0xfe   : > { %v2437_v37 = vpop.f32.mrb[5].mxu0  ;;  %v2445_v38 = vpop.f32.mrb[5].mxu1  ;;  %v715_v21 = vadd.f32 %v2230_v17, %v714_v35  ;;  %v767_v22 = vadd.f32 %v2231_v18, %v766_v36 }
  0xff   : > { %v717_v39 = vpop.f32.mrb[6].mxu0  ;;  %v769_v40 = vpop.f32.mrb[6].mxu1 }
 0x100   : > { %v2438_v41 = vpop.f32.mrb[7].mxu0  ;;  %v2446_v42 = vpop.f32.mrb[7].mxu1  ;;  %v1282_v23 = vpack.c.bf16 %v715_v21, %v715_v21  ;;  %v1283_v24 = vpack.c.bf16 %v767_v22, %v767_v22 }
 0x105   : > { %v864_v45 = vpop.f32.mrb[8].mxu0  ;;  %v916_v46 = vpop.f32.mrb[8].mxu1 }
 0x106   : > { %v865_v47 = vadd.f32 %v2264_v43, %v864_v45  ;;  %v917_v48 = vadd.f32 %v2265_v44, %v916_v46  ;;  %v2453_v49 = vpop.f32.mrb[9].mxu0  ;;  %v2461_v50 = vpop.f32.mrb[9].mxu1 }
 0x107   : > { %v867_v51 = vpop.f32.mrb[10].mxu0  ;;  %v919_v52 = vpop.f32.mrb[10].mxu1  ;;  %v506_v49 = vld [vmem:[%s3312_s1] sm:$0xff] }
 0x108   : > { %v1284_v53 = vpack.c.bf16 %v865_v47, %v865_v47  ;;  %v1285_v54 = vpack.c.bf16 %v917_v48, %v917_v48  ;;  %v2454_v55 = vpop.f32.mrb[11].mxu0  ;;  %v2462_v56 = vpop.f32.mrb[11].mxu1  ;;  %v2227_v50 = vld [vmem:[%s503_s24] ss:$0 sm:$0xff]  ;;  %s2153_s24 = sshll.u32 %s496_s27, 4  ;;  %s3242_s24 = int_to_ptr.vmem [resolvable:$true] %s2153_s24 }
 0x109   : > { %v514_v51 = vadd.f32 %v2227_v50, %v506_v49  ;;  %s2694_s26 = scalar_lea.vmem %s3242_s24, 128  ;;  %p2701_p0 = scmp.lt.s32.totalorder %s3242_s24, %s2699_s25 }
 0x10a   : > { %v1293_v59 = vsel %vm1288_vm2, %v1284_v53, 0  ;;  %v1339_v60 = vsel %vm1288_vm2, %v1285_v54, 0  ;;  %p2695_p11 = scmp.ne.s32.totalorder %s3242_s24, %s2694_s26  ;;  %p2702_p1 = scmp.lt.s32.totalorder %s2700_s30, %s2694_s26 }
 0x10b   : > { %2512 = vmatpush3.bf16.xpose.msra.mxu0 %v1293_v59  ;;  %2518 = vmatpush3.bf16.xpose.msra.mxu1 %v1339_v60 }
 0x10c   : > { %2523 = vmatprep.subr.bf16.mxu0 %v2758_v1  ;;  %2529 = vmatprep.subr.bf16.mxu1 %v2758_v1  ;;  %p2696_p12 = pnand %p2695_p11, %p2879_p5  ;;  %p2703_p2 = por %p2702_p1, %p2701_p0 }
 0x10d   : > { %v968_v2 = vpop.f32.mrb[12].mxu0  ;;  %v1020_v3 = vpop.f32.mrb[12].mxu1 }
 0x10e   : > { %v969_v4 = vadd.f32 %v2266_v61, %v968_v2  ;;  %v1021_v5 = vadd.f32 %v2267_v62, %v1020_v3  ;;  %v2469_v6 = vpop.f32.mrb[13].mxu0  ;;  %v2477_v8 = vpop.f32.mrb[13].mxu1  ;;  %p2697_p13 = pneg %p2696_p12 }
 0x10f   : > { %v971_v9 = vpop.f32.mrb[14].mxu0  ;;  %v1023_v10 = vpop.f32.mrb[14].mxu1 }
 0x110   : > { %v1286_v13 = vpack.c.bf16 %v969_v4, %v969_v4  ;;  %v1287_v14 = vpack.c.bf16 %v1021_v5, %v1021_v5  ;;  %v2470_v15 = vpop.f32.mrb[15].mxu0  ;;  %v2478_v16 = vpop.f32.mrb[15].mxu1  ;;  %p2704_p3 = pnand %p2703_p2, %p2697_p13 }
 0x112   : > { %v1385_v19 = vsel %vm1288_vm2, %v1286_v13, 0  ;;  %v1431_v20 = vsel %vm1288_vm2, %v1287_v14, 0  ;;  %2514 = vmatmul.mubr.msk.bf16.vlgmr.msra.gmra.mrb[24].mxu0 %vm1288_vm2, %v1280_v11  ;;  %2520 = vmatmul.mubr.msk.bf16.vlgmr.msra.gmra.mrb[24].mxu1 %vm1288_vm2, %v1281_v12 }
 0x113   : > { %2524 = vmatpush3.bf16.xpose.msra.mxu0 %v1385_v19  ;;  %2530 = vmatpush3.bf16.xpose.msra.mxu1 %v1431_v20 }
 0x114   : > { %2525 = vmatprep.mubr.msk.bf16.mxu0 %vm2759_vm0, %v2758_v1  ;;  %2531 = vmatprep.mubr.msk.bf16.mxu1 %vm2759_vm0, %v2758_v1 }
 0x115   : > { %2535 = vmatprep.subr.bf16.mxu0 %v2758_v1  ;;  %2541 = vmatprep.subr.bf16.mxu1 %v2758_v1  ;;  %v1118_v26 = vpop.f32.mrb[16].mxu0 }
 0x116   : > { %v1119_v28 = vadd.f32 %v2300_v25, %v1118_v26  ;;  %v2485_v29 = vpop.f32.mrb[17].mxu0 }
 0x117   : > { %v1121_v30 = vpop.f32.mrb[18].mxu0  ;;  %v1170_v31 = vpop.f32.mrb[16].mxu1 }
 0x118   : > { %v1529_v32 = vpack.c.bf16 %v1119_v28, %v1119_v28  ;;  %v2486_v33 = vpop.f32.mrb[19].mxu0  ;;  %v1171_v34 = vadd.f32 %v2301_v27, %v1170_v31  ;;  %v2493_v35 = vpop.f32.mrb[17].mxu1 }
 0x119   : > { %v1173_v36 = vpop.f32.mrb[18].mxu1 }
 0x11a   : > { %2526 = vmatmul.mubr.msk.bf16.vlgmr.msra.gmra.mrb[28].mxu0 %vm1288_vm2, %v1282_v23  ;;  %2532 = vmatmul.mubr.msk.bf16.vlgmr.msra.gmra.mrb[28].mxu1 %vm1288_vm2, %v1283_v24  ;;  %v1538_v37 = vsel %vm1536_vm3, %v1529_v32, 0  ;;  %v1530_v38 = vpack.c.bf16 %v1171_v34, %v1171_v34  ;;  %v2494_v39 = vpop.f32.mrb[19].mxu1 }
 0x11b   : > { %2537 = vmatprep.mubr.msk.bf16.mxu0 %vm2759_vm0, %v2758_v1  ;;  %2543 = vmatprep.mubr.msk.bf16.mxu1 %vm2759_vm0, %v2758_v1 }
 0x11c   : > { %2536 = vmatpush3.bf16.msra.mxu0 %v1538_v37  ;;  %v1584_v40 = vsel %vm1536_vm3, %v1530_v38, 0 }
 0x11d   : > { %2547 = vmatprep.subr.bf16.mxu0 %v2758_v1  ;;  %2542 = vmatpush3.bf16.msra.mxu1 %v1584_v40  ;;  %v3107_v41 = vpop.f32.mrb[20].mxu0  ;;  %v2302_v40 = vld [vmem:[%s3287_s4 + $0xa] ss:$0 sm:$0xff] }
 0x11e   : > { %2553 = vmatprep.subr.bf16.mxu1 %v2758_v1  ;;  %v2501_v43 = vpop.f32.mrb[21].mxu0 }
 0x11f   : > { %v3109_v42 = vpop.f32.mrb[20].mxu1  ;;  %v1225_v45 = vpop.f32.mrb[22].mxu0  ;;  %v1223_v43 = vadd.f32 %v2302_v40, %v3107_v41 }
 0x120   : > { %v2509_v44 = vpop.f32.mrb[21].mxu1  ;;  %v2502_v47 = vpop.f32.mrb[23].mxu0  ;;  %v2303_v45 = vld [vmem:[%s3287_s4 + $0xb] ss:$0 sm:$0xff] }
 0x121   : > { %v1277_v46 = vpop.f32.mrb[22].mxu1  ;;  %v1531_v47 = vpack.c.bf16 %v1223_v43, %v1223_v43 }
 0x122   : > { %v2510_v48 = vpop.f32.mrb[23].mxu1 }
 0x123   : > { %v1275_v48 = vadd.f32 %v2303_v45, %v3109_v42  ;;  %v1722_v42 = vld [vmem:[%s3288_s5] sm:$0xf] }
 0x1e5   : > { %v1329_v52 = vpop.f32.mrb[24].mxu0  ;;  %v1375_v53 = vpop.f32.mrb[24].mxu1 }
 0x1e6   : > { %v1473_v54 = vmul.f32 0.35355338, %v1329_v52  ;;  %v1474_v55 = vmul.f32 0.35355338, %v1375_v53  ;;  %v2515_v56 = vpop.f32.mrb[25].mxu0  ;;  %v2521_v57 = vpop.f32.mrb[25].mxu1 }
 0x1e7   : > { %v1332_v58 = vpop.f32.mrb[26].mxu0  ;;  %v1378_v59 = vpop.f32.mrb[26].mxu1  ;;  %v1630_v53 = vsel %vm1536_vm3, %v1531_v47, 0 }
 0x1e8   : > { %v2516_v60 = vpop.f32.mrb[27].mxu0  ;;  %v2522_v61 = vpop.f32.mrb[27].mxu1  ;;  %v1477_v62 = vadd.f32 %v1473_v54, %v514_v51  ;;  %v1478_v63 = vadd.f32 %v1474_v55, %v514_v51  ;;  %v1532_v54 = vpack.c.bf16 %v1275_v48, %v1275_v48 }
 0x1e9   : > { %v1730_v60 = vsel %vm1536_vm3, %v1722_v42, 0 }
 0x1ea   : > { %v1481_v0 = vsel %vm1288_vm2, %v1477_v62, -inf  ;;  %v1484_v4 = vsel %vm1288_vm2, %v1478_v63, -inf  ;;  %v1676_v57 = vsel %vm1536_vm3, %v1532_v54, 0 }
 0x1eb   : > { %1482 = vmax.xlane.f32.xlu0 %v1481_v0  ;;  %v1723_v0 = vld [vmem:[%s3288_s5 + $0x4] sm:$0xf] }
 0x1ed   : > { %v1421_v2 = vpop.f32.mrb[28].mxu0  ;;  %v1467_v3 = vpop.f32.mrb[28].mxu1 }
 0x1ee   : > { %v1475_v5 = vmul.f32 0.35355338, %v1421_v2  ;;  %v1476_v6 = vmul.f32 0.35355338, %v1467_v3  ;;  %v2527_v8 = vpop.f32.mrb[29].mxu0  ;;  %v2533_v9 = vpop.f32.mrb[29].mxu1 }
 0x1ef   : > { %v1470_v10 = vpop.f32.mrb[30].mxu1  ;;  %1485 = vmax.xlane.f32.xlu0 %v1484_v4  ;;  %v1424_v11 = vpop.f32.mrb[30].mxu0  ;;  %v1776_v2 = vsel %vm1536_vm3, %v1723_v0, 0  ;;  %v1724_v3 = vld [vmem:[%s3288_s5 + $0x8] sm:$0xf] }
 0x1f0   : > { %v2528_v12 = vpop.f32.mrb[31].mxu0  ;;  %v2534_v13 = vpop.f32.mrb[31].mxu1  ;;  %v1479_v14 = vadd.f32 %v1475_v5, %v514_v51  ;;  %v1480_v16 = vadd.f32 %v1476_v6, %v514_v51  ;;  %v1822_v8 = vsel %vm1536_vm3, %v1724_v3, 0  ;;  %v1725_v10 = vld [vmem:[%s3288_s5 + $0xc] sm:$0xf] }
 0x1f2   : > { %v1487_v15 = vsel %vm1288_vm2, %v1479_v14, -inf  ;;  %v1490_v17 = vsel %vm1288_vm2, %v1480_v16, -inf }
 0x1f3   : > { %1488 = vmax.xlane.f32.xlu1 %v1487_v15  ;;  %v1868_v15 = vsel %vm1536_vm3, %v1725_v10, 0 }
 0x1f7   : > { %1491 = vmax.xlane.f32.xlu1 %v1490_v17 }
 0x278   : > { %v1483_v18 = vpop.xlane.xlu0 %1482 }
 0x279   : > { %v1493_v19 = vsub.f32 %v1477_v62, %v1483_v18 }
 0x27b   : > { %v1497_v20 = vmul.f32 1.442695, %v1493_v19 }
 0x27c   : > { %v1486_v21 = vpop.xlane.xlu0 %1485 }
 0x27d   : > { %2674 = vpow2.f32 %v1497_v20  ;;  %v1494_v22 = vsub.f32 %v1478_v63, %v1486_v21 }
 0x27f   : > { %v1499_v23 = vmul.f32 1.442695, %v1494_v22 }
 0x280   : > { %v1489_v24 = vpop.xlane.xlu1 %1488 }
 0x281   : > { %2676 = vpow2.f32 %v1499_v23  ;;  %v1495_v25 = vsub.f32 %v1479_v14, %v1489_v24 }
 0x283   : > { %v1501_v26 = vmul.f32 1.442695, %v1495_v25 }
 0x284   : > { %v1492_v27 = vpop.xlane.xlu1 %1491 }
 0x285   : > { %2678 = vpow2.f32 %v1501_v26  ;;  %v1496_v28 = vsub.f32 %v1480_v16, %v1492_v27 }
 0x287   : > { %v2675_v29 = vpop.eup %2674  ;;  %v1503_v30 = vmul.f32 1.442695, %v1496_v28 }
 0x288   : > { %v1505_v31 = vsel %vm1288_vm2, %v2675_v29, 0.0 }
 0x289   : > { %2680 = vpow2.f32 %v1503_v30  ;;  %1506 = vadd.xlane.f32.xlu0 %v1505_v31 }
 0x28b   : > { %v2677_v32 = vpop.eup %2676 }
 0x28c   : > { %v1508_v33 = vsel %vm1288_vm2, %v2677_v32, 0.0 }
 0x28d   : > { %1509 = vadd.xlane.f32.xlu1 %v1508_v33 }
 0x28f   : > { %v2679_v34 = vpop.eup %2678 }
 0x290   : > { %v1511_v35 = vsel %vm1288_vm2, %v2679_v34, 0.0 }
 0x291   : > { %1512 = vadd.xlane.f32.xlu0 %v1511_v35 }
 0x293   : > { %v2681_v36 = vpop.eup %2680 }
 0x294   : > { %v1514_v37 = vsel %vm1288_vm2, %v2681_v36, 0.0 }
 0x295   : > { %1515 = vadd.xlane.f32.xlu1 %v1514_v37 }
 0x316   : > { %v1507_v38 = vpop.xlane.xlu0 %1506 }
 0x317   : > { %2682 = vrcp.f32 %v1507_v38 }
 0x31a   : > { %v1510_v39 = vpop.xlane.xlu1 %1509 }
 0x31b   : > { %2684 = vrcp.f32 %v1510_v39 }
 0x31e   : > { %v1513_v44 = vpop.xlane.xlu0 %1512 }
 0x31f   : > { %2686 = vrcp.f32 %v1513_v44 }
 0x321   : > { %v2683_v46 = vpop.eup %2682 }
 0x322   : > { %v1521_v49 = vmul.f32 %v2683_v46, %v2675_v29  ;;  %v1516_v50 = vpop.xlane.xlu1 %1515 }
 0x323   : > { %2688 = vrcp.f32 %v1516_v50 }
 0x324   : > { %v1525_v51 = vpack.c.bf16 %v1521_v49, %v1521_v49  ;;  %v2328_v49 = vld [vmem:[%s3289_s6] ss:$0 sm:$0xff] }
 0x325   : > { %v2685_v52 = vpop.eup %2684 }
 0x326   : > { %v1522_v55 = vmul.f32 %v2685_v52, %v2677_v32  ;;  %2538 = vmatmul.mubr.msk.bf16.vlgmr.msra.gmra.mrb[32].mxu0 %vm1288_vm2, %v1525_v51 }
 0x327   : > { %2548 = vmatpush3.bf16.msra.mxu0 %v1630_v53  ;;  %2549 = vmatprep.mubr.msk.bf16.mxu0 %vm2759_vm0, %v2758_v1 }
 0x328   : > { %v1526_v41 = vpack.c.bf16 %v1522_v55, %v1522_v55  ;;  %2559 = vmatprep.subr.bf16.mxu0 %v2758_v1 }
 0x329   : > { %v2687_v56 = vpop.eup %2686 }
 0x32a   : > { %v1523_v58 = vmul.f32 %v2687_v56, %v2679_v34  ;;  %2544 = vmatmul.mubr.msk.bf16.vlgmr.msra.gmra.mrb[32].mxu1 %vm1288_vm2, %v1526_v41 }
 0x32b   : > { %2554 = vmatpush3.bf16.msra.mxu1 %v1676_v57  ;;  %2555 = vmatprep.mubr.msk.bf16.mxu1 %vm2759_vm0, %v2758_v1 }
 0x32c   : > { %v1527_v59 = vpack.c.bf16 %v1523_v58, %v1523_v58  ;;  %2565 = vmatprep.subr.bf16.mxu1 %v2758_v1 }
 0x32d   : > { %v2689_v61 = vpop.eup %2688 }
 0x32e   : > { %v1524_v62 = vmul.f32 %v2689_v61, %v2681_v36  ;;  %2550 = vmatmul.mubr.msk.bf16.vlgmr.msra.gmra.mrb[36].mxu0 %vm1288_vm2, %v1527_v59  ;;  %v2669_v61 = vld [vmem:[%s3292_s9 + $0x8] sm:$0xff]  }
 0x32f   : > { %2560 = vmatpush3.bf16.msra.mxu0 %v1730_v60  ;;  %2561 = vmatprep.mubr.msk.bf16.mxu0 %vm2759_vm0, %v2758_v1  ;;  %v2668_v60 = vld [vmem:[%s3292_s9] sm:$0xff]  }
 0x330   : > { %v1528_v63 = vpack.c.bf16 %v1524_v62, %v1524_v62  ;;  %2571 = vmatprep.subr.bf16.mxu0 %v2758_v1  ;;  %v2671_v62 = vld [vmem:[%s3294_s11 + $0x8] sm:$0xff]  }
 0x332   : > { %2556 = vmatmul.mubr.msk.bf16.vlgmr.msra.gmra.mrb[36].mxu1 %vm1288_vm2, %v1528_v63 }
 0x333   : > { %2567 = vmatprep.mubr.msk.bf16.mxu1 %vm2759_vm0, %v2758_v1  ;;  %2566 = vmatpush3.bf16.msra.mxu1 %v1776_v2 }
 0x334   : > { %2577 = vmatprep.subr.bf16.mxu1 %v2758_v1 }
 0x3f9   : > { %v1574_v4 = vpop.f32.mrb[32].mxu0 }
 0x3fa   : > { %v1718_v5 = vpack.c.bf16 %v1574_v4, %v1574_v4  ;;  %v2539_v6 = vpop.f32.mrb[33].mxu0  ;;  %v2329_v4 = vld [vmem:[%s3290_s7] ss:$0 sm:$0xff] }
 0x3fb   : > { %v1577_v9 = vpop.f32.mrb[34].mxu0  ;;  %v2330_v6 = vld [vmem:[%s3291_s8] ss:$0 sm:$0xff] }
 0x3fc   : > { %v2540_v11 = vpop.f32.mrb[35].mxu0  ;;  %2562 = vmatmul.mubr.msk.bf16.vlgmr.msra.gmra.mrb[40].mxu0 %vm1288_vm2, %v1718_v5 }
 0x3fd   : > { %v1620_v12 = vpop.f32.mrb[32].mxu1  ;;  %2572 = vmatpush3.bf16.msra.mxu0 %v1822_v8  ;;  %2573 = vmatprep.mubr.msk.bf16.mxu0 %vm2759_vm0, %v2758_v1  ;;  %v2672_v11 = vld [vmem:[%s3294_s11 + $0x10] sm:$0xff]  }
 0x3fe   : > { %v1719_v13 = vpack.c.bf16 %v1620_v12, %v1620_v12  ;;  %v2545_v14 = vpop.f32.mrb[33].mxu1  ;;  %2583 = vmatprep.subr.bf16.mxu0 %v2758_v1  ;;  %v2673_v12 = vld [vmem:[%s3294_s11 + $0x18] sm:$0xff]  }
 0x3ff   : > { %v1623_v16 = vpop.f32.mrb[34].mxu1 }
 0x400   : > { %v2546_v17 = vpop.f32.mrb[35].mxu1  ;;  %2568 = vmatmul.mubr.msk.bf16.vlgmr.msra.gmra.mrb[40].mxu1 %vm1288_vm2, %v1719_v13  ;;  %v2331_v13 = vld [vmem:[%s3293_s10] ss:$0 sm:$0xff] }
 0x401   : > { %v1666_v18 = vpop.f32.mrb[36].mxu0  ;;  %2578 = vmatpush3.bf16.msra.mxu1 %v1868_v15  ;;  %2579 = vmatprep.mubr.msk.bf16.mxu1 %vm2759_vm0, %v2758_v1 }
 0x402   : > { %v1720_v19 = vpack.c.bf16 %v1666_v18, %v1666_v18  ;;  %v2551_v20 = vpop.f32.mrb[37].mxu0  ;;  %2591 = vmatprep.subr.bf16.mxu1 %v2758_v1 }
 0x403   : > { %v1669_v21 = vpop.f32.mrb[38].mxu0 }
 0x404   : > { %v2552_v22 = vpop.f32.mrb[39].mxu0  ;;  %2574 = vmatmul.mubr.msk.bf16.vlgmr.msra.gmra.mrb[44].mxu0 %vm1288_vm2, %v1720_v19 }
 0x405   : > { %v1712_v23 = vpop.f32.mrb[36].mxu1  ;;  %2587 = vmatprep.mubr.msk.bf16.mxu0 %vm2759_vm0, %v2758_v1  ;;  %2584 = vmatpush3.bf16.msra.mxu0 %v2668_v60 }
 0x406   : > { %v1721_v24 = vpack.c.bf16 %v1712_v23, %v1712_v23  ;;  %v2557_v25 = vpop.f32.mrb[37].mxu1  ;;  %2585 = vmatprep.subr.bf16.mxu0 %v2758_v1 }
 0x407   : > { %v1715_v26 = vpop.f32.mrb[38].mxu1 }
 0x408   : > { %v2558_v27 = vpop.f32.mrb[39].mxu1  ;;  %2580 = vmatmul.mubr.msk.bf16.vlgmr.msra.gmra.mrb[44].mxu1 %vm1288_vm2, %v1721_v24 }
 0x409   : > { %2599 = vmatprep.mubr.msk.bf16.mxu1 %vm2759_vm0, %v2758_v1  ;;  %2586 = vmatpush3.bf16.msra.mxu0 %v2669_v61 }
 0x4cf   : > { %v1766_v28 = vpop.f32.mrb[40].mxu0 }
 0x4d0   : > { %v2563_v29 = vpop.f32.mrb[41].mxu0  ;;  %v1910_v33 = vsel %vm572_vm1, %v1766_v28, 0.0 }
 0x4d1   : > { %v1769_v30 = vpop.f32.mrb[42].mxu0 }
 0x4d2   : > { %v2564_v31 = vpop.f32.mrb[43].mxu0 }
 0x4d3   : > { %v1812_v32 = vpop.f32.mrb[40].mxu1 }
 0x4d4   : > { %v1911_v34 = vsel %vm572_vm1, %v1812_v32, 0.0  ;;  %v2569_v35 = vpop.f32.mrb[41].mxu1 }
 0x4d5   : > { %v1912_v36 = vadd.f32 %v1911_v34, %v1910_v33  ;;  %v1815_v37 = vpop.f32.mrb[42].mxu1 }
 0x4d6   : > { %v2570_v38 = vpop.f32.mrb[43].mxu1  ;;  %v2341_v37 = vld [vmem:[%s3296_s13] ss:$0 sm:$0xff] }
 0x4d7   : > { %v1858_v39 = vpop.f32.mrb[44].mxu0 }
 0x4d8   : > { %v1913_v40 = vsel %vm572_vm1, %v1858_v39, 0.0  ;;  %v2575_v43 = vpop.f32.mrb[45].mxu0  ;;  %v2342_v39 = vld [vmem:[%s3297_s14] ss:$0 sm:$0xff] }
 0x4d9   : > { %v1914_v44 = vadd.f32 %v1913_v40, %v1912_v36  ;;  %v1861_v45 = vpop.f32.mrb[46].mxu0 }
 0x4da   : > { %v2576_v46 = vpop.f32.mrb[47].mxu0 }
 0x4db   : > { %v1904_v47 = vpop.f32.mrb[44].mxu1 }
 0x4dc   : > { %v1915_v48 = vsel %vm572_vm1, %v1904_v47, 0.0  ;;  %v2581_v50 = vpop.f32.mrb[45].mxu1 }
 0x4dd   : > { %v1916_v51 = vadd.f32 %v1915_v48, %v1914_v44  ;;  %v1907_v52 = vpop.f32.mrb[46].mxu1 }
 0x4de   : > { %v2582_v53 = vpop.f32.mrb[47].mxu1 }
 0x4df   : > { %v1924_v54 = vadd.f32 %v2328_v49, %v1916_v51 }
 0x4e1   : > { %v1925_v55 = vadd.f32 %v1924_v54, %v2924_v7  ;;  %v2670_v7 = vld [vmem:[%s3294_s11] sm:$0xff]  }
 0x4e2   : > { %2592 = vmatpush3.bf16.msra.mxu1 %v2670_v7 }
 0x4e3   : > { %v1926_v41 = vsel %vm572_vm1, %v1925_v55, 0.0  ;;  %2593 = vmatprep.subr.bf16.mxu1 %v2758_v1 }
 0x4e4   : > { %1927 = vadd.xlane.f32.xlu0 %v1926_v41 }
 0x4e6   : > { %2594 = vmatpush3.bf16.msra.mxu1 %v2671_v62 }
 0x4e7   : > { %2595 = vmatprep.subr.bf16.mxu1 %v2758_v1 }
 0x4ea   : > { %2596 = vmatpush3.bf16.msra.mxu1 %v2672_v11 }
 0x4eb   : > { %2597 = vmatprep.subr.bf16.mxu1 %v2758_v1  ;;  %v2335_v1 = vld [vmem:[%s3295_s12] ss:$0 sm:$0xff] }
 0x4ee   : > { %2598 = vmatpush3.bf16.msra.mxu1 %v2673_v12 }
 0x571   : > { %v1928_v56 = vpop.xlane.xlu0 %1927 }
 0x572   : > { %v1930_v42 = vmul.f32 0.03125, %v1928_v56 }
 0x574   : > { %v1931_v57 = vsub.f32 %v1925_v55, %v1930_v42 }
 0x576   : > { %v1932_v58 = vmul.f32 %v1931_v57, %v1931_v57 }
 0x578   : > { %v1933_v59 = vsel %vm572_vm1, %v1932_v58, 0.0 }
 0x579   : > { %1934 = vadd.xlane.f32.xlu1 %v1933_v59 }
 0x606   : > { %v1935_v63 = vpop.xlane.xlu1 %1934 }
 0x607   : > { %v1936_v0 = vmul.f32 0.03125, %v1935_v63 }
 0x609   : > { %v1937_v2 = vadd.f32 1e-05, %v1936_v0 }
 0x60b   : > { %2690 = vrsqrt.f32 %v1937_v2 }
 0x615   : > { %v2691_v3 = vpop.eup %2690 }
 0x616   : > { %v1939_v5 = vmul.f32 %v2691_v3, %v1931_v57 }
 0x618   : > { %v1947_v8 = vmul.f32 %v2329_v4, %v1939_v5 }
 0x61a   : > { %v1955_v9 = vadd.f32 %v2330_v6, %v1947_v8 }
 0x61c   : > { %v1956_v10 = vpack.c.bf16 %v1955_v9, %v1955_v9 }
 0x61e   : > { %2588 = vmatmul.mubr.msk.bf16.vlgmr.msra.gmra.mrb[48].mxu0 %vm572_vm1, %v1956_v10 }
 0x6f1   : > { %v2017_v14 = vpop.f32.mrb[48].mxu0 }
 0x6f2   : > { %v2018_v15 = vadd.f32 %v2331_v13, %v2017_v14  ;;  %v2589_v16 = vpop.f32.mrb[49].mxu0 }
 0x6f3   : > { %v2020_v17 = vpop.f32.mrb[50].mxu0 }
 0x6f4   : > { %v2023_v18 = vmax.f32 %v2018_v15, 0.0  ;;  %v2590_v19 = vpop.f32.mrb[51].mxu0 }
 0x6f6   : > { %v2024_v20 = vpack.c.bf16 %v2023_v18, %v2023_v18 }
 0x6f8   : > { %2600 = vmatmul.mubr.msk.bf16.vlgmr.msra.gmra.mrb[48].mxu1 %vm2064_vm4, %v2024_v20 }
 0x7cb   : > { %v2102_v21 = vpop.f32.mrb[48].mxu1 }
 0x7cc   : > { %v2103_v22 = vadd.f32 %v2335_v1, %v2102_v21  ;;  %v2601_v23 = vpop.f32.mrb[49].mxu1 }
 0x7cd   : > { %v2105_v24 = vpop.f32.mrb[50].mxu1 }
 0x7ce   : > { %v2602_v25 = vpop.f32.mrb[51].mxu1  ;;  %v2108_v26 = vadd.f32 %v2103_v22, %v1955_v9 }
 0x7d0   : > { %v2109_v27 = vsel %vm572_vm1, %v2108_v26, 0.0 }
 0x7d1   : > { %2110 = vadd.xlane.f32.xlu0 %v2109_v27 }
 0x85e   : > { %v2111_v28 = vpop.xlane.xlu0 %2110 }
 0x85f   : > { %v2112_v29 = vmul.f32 0.03125, %v2111_v28 }
 0x861   : > { %v2113_v30 = vsub.f32 %v2108_v26, %v2112_v29 }
 0x863   : > { %v2114_v31 = vmul.f32 %v2113_v30, %v2113_v30 }
 0x865   : > { %v2115_v32 = vsel %vm572_vm1, %v2114_v31, 0.0 }
 0x866   : > { %2116 = vadd.xlane.f32.xlu1 %v2115_v32 }
 0x8f3   : > { %v2117_v33 = vpop.xlane.xlu1 %2116 }
 0x8f4   : > { %v2118_v34 = vmul.f32 0.03125, %v2117_v33 }
 0x8f6   : > { %v2119_v35 = vadd.f32 1e-05, %v2118_v34 }
 0x8f8   : > { %2692 = vrsqrt.f32 %v2119_v35 }
 0x902   : > { %v2693_v36 = vpop.eup %2692 }
 0x903   : > { %v2121_v38 = vmul.f32 %v2693_v36, %v2113_v30 }
 0x905   : > { %v2129_v40 = vmul.f32 %v2341_v37, %v2121_v38 }
 0x907   : > { %v2137_v43 = vadd.f32 %v2342_v39, %v2129_v40 }
 0x909   : > { %2138 = vst.msk [vmem:[%s496_s27] sm:$0xff] %vm572_vm1, %v2137_v43 }
 0x90a   : > { %2707 = shalt.err (!%p2704_p3)
}
 0x90b   : > { %s2708_s0 = scalar_lea.hbm %s3240_s2, 128  ;;  %s2712_s16 = scalar_lea.hbm %s3298_s15, 256 }
 0x90c   : > { %p2709_p4 = scmp.ne.s32.totalorder %s3240_s2, %s2708_s0  ;;  %p2713_p9 = scmp.lt.u32.totalorder %s3240_s2, %s3298_s15 }
 0x90d   : > { %p2714_p10 = scmp.lt.u32.totalorder %s2712_s16, %s2708_s0  ;;  %p2716_p12 = scmp.lt.u32.totalorder %s2708_s0, %s3240_s2 }
 0x90e   : > { %p2710_p7 = pnand %p2709_p4, %p2879_p5 }
 0x90f   : > { %p2715_p11 = por %p2714_p10, %p2713_p9 }
 0x910   : > { %p2711_p8 = pneg %p2710_p7 }
 0x911   : > { %p2717_p13 = por %p2716_p12, %p2715_p11 }
 0x913   : > { %p2718_p0 = pnand %p2717_p13, %p2711_p8 }
 0x915   : > { %2721 = shalt.err (!%p2718_p0)
}
 0x916   : > { %2603 = dma.vmem_to_hbm [thread:$0]  (%p2879_p5), %s3242_s24, 128, %s3240_s2, %s2140_s17  }
 0x917 PF: > { %p2609_p1 = scmp.ge.s32.totalorder %s2756_s21, 2  ;;  %s2165_s26 = sand.u32 1, %s2744_s18  }
 0x918   : > { %s2166_s22 = scalar_lea.sflag [#allocation3], %s2165_s26 }
 0x919   : > { %p2606_p2 = pnand %p2609_p1, %p2883_p6 }
 0x91b   : > { %2739 = dma.done.wait (!%p2606_p2), %s2166_s22, 128  }
 0x91c   : > { %2741 = vsyncadd (!%p2606_p2), %s2166_s22, 4294967168  ;;  %s3313_s21 = sld [smem:[#allocation6_spill]]  ;;  %s3314_s25 = sld [smem:[#allocation5_spill]] }
 0x91d   : > { %s3315_s20 = sld [smem:[#allocation7_spill]]  ;;  %s3316_s18 = smov %s2748_s19 }
 0x922   : > { %p25_p3 = scmp.ge.s32.totalorder %s3313_s21, 4   ;;  %s3317_s19 = smov %s3314_s25 }
 0x924   :  { %27 = sbr.rel (!%p25_p3) target bundleno = 7 (0x7), region = 122 }
 0x92b   :  { %2171 = vsyncpa [#allocation3], 1 }
 0x92c   :  { %2173 = vsyncpa [#allocation3 + $0x1], 1 }

</bundles_post_ra>
